<compile_context>
chip_gen: v7x
topology: tpu7x:2x2x1
jax: 0.10.0
libtpu: 0.0.40
codegen_flags: <defaults>
</compile_context>

<pallas_src>
import functools

import jax
import jax.numpy as jnp
from jax.experimental import pallas as pl
from jax.experimental.pallas import tpu as pltpu

BN_EPS = 1e-3          # nn.BatchNorm1d(..., eps=0.001)
NEG_INF = -1e30        # bias for padded softmax columns


def _round_up(x, m):
    return (x + m - 1) // m * m


def _cdiv(a, b):
    return -(-a // b)


# ----------------------------------------------------------------------------
# Kernel
# ----------------------------------------------------------------------------
def decoder_lognorm_nb_kernel(
    z_ref, w1_ref, b1_ref, wcat_ref, bcat_ref, esf_ref,
    norm_out, disp_out, scale_out, *, i_pad, n_out,
):
    # --- Linear(+folded eval-mode BN) -> ReLU --------------------------------
    h = jnp.dot(z_ref[...].astype(w1_ref.dtype), w1_ref[...],
                preferred_element_type=jnp.float32)
    latent = jnp.maximum(h + b1_ref[...], 0.0)                       # f32

    # --- fused heads: ONE wide MXU matmul over w_cat = [w_scale | w_r] -------
    sr = jnp.dot(latent.astype(wcat_ref.dtype), wcat_ref[...],
                 preferred_element_type=jnp.float32) + bcat_ref[...]
    s = sr[:, :i_pad]          # decoder_scale logits (padded cols hold -1e30)
    r = sr[:, i_pad:]          # decoder_r pre-activation

    # --- numerically stable softmax over features (dim=1) --------------------
    s_max = jnp.max(s, axis=1, keepdims=True)
    e = jnp.exp(s - s_max)                               # padded cols -> 0
    denom = jnp.sum(e, axis=1, keepdims=True)
    inv = pl.reciprocal(denom, approx=True)              # EUP slot
    inv = inv * (2.0 - denom * inv)                      # Newton step on (tb,1): near-exact simplex
    normalized = e * inv

    nrm = normalized[:, :n_out]                          # drop lane padding in-kernel
    norm_out[...] = nrm.astype(norm_out.dtype)
    disp_out[...] = jnp.exp(r[:, :n_out]).astype(disp_out.dtype)
    scale_out[...] = (esf_ref[...] * nrm).astype(scale_out.dtype)    # (tb,1) broadcast


# ----------------------------------------------------------------------------
# One-time weight preparation (call once at model load, NOT per forward)
# ----------------------------------------------------------------------------
def prepare_decoder_params(params, use_bf16=True):
    """Fold eval-mode BatchNorm into Linear-0, pad the feature axis to 128
    lanes, concatenate the two heads, and cast MXU operands.  Hoisted out of
    the per-call path (review item: weight prep cost could exceed the kernel)."""
    f32 = jnp.float32
    mxu_dtype = jnp.bfloat16 if use_bf16 else f32
    latent_dim, hidden = params["w1"].shape
    input_size = params["w_scale"].shape[1]

    inv_std = jax.lax.rsqrt(params["bn_var"].astype(f32) + BN_EPS)    # (1, hidden)
    bn_scale = params["bn_gamma"] * inv_std
    w1f = (params["w1"] * bn_scale).astype(mxu_dtype)                 # (L, H)
    b1f = ((params["b1"] - params["bn_mean"]) * bn_scale
           + params["bn_beta"]).astype(f32)                           # (1, H)

    i_pad = _round_up(input_size, 128)
    pad_c = i_pad - input_size
    w_scale = jnp.pad(params["w_scale"], ((0, 0), (0, pad_c)))
    w_r = jnp.pad(params["w_r"], ((0, 0), (0, pad_c)))
    b_scale = jnp.pad(params["b_scale"], ((0, 0), (0, pad_c)),
                      constant_values=NEG_INF)        # padded logits -> exp()=0
    b_r = jnp.pad(params["b_r"], ((0, 0), (0, pad_c)))
    w_cat = jnp.concatenate([w_scale, w_r], axis=1).astype(mxu_dtype)  # (H, 2*Ip)
    b_cat = jnp.concatenate([b_scale, b_r], axis=1).astype(f32)        # (1, 2*Ip)

    return {
        "w1f": w1f, "b1f": b1f, "w_cat": w_cat, "b_cat": b_cat,
        "latent_dim": int(latent_dim), "hidden": int(hidden),
        "input_size": int(input_size), "i_pad": int(i_pad),
        "mxu_dtype": mxu_dtype,
    }


# ----------------------------------------------------------------------------
# Forward wrapper
# ----------------------------------------------------------------------------
def decoder_lognorm_nb_forward(z, scale_factor, prep, *,
                               batch_tile=512, out_dtype=jnp.float32):
    """Fused DecoderLogNormNB forward.  `prep` = prepare_decoder_params(...).
    For v5e-class HBM-bound deployments, pass out_dtype=jnp.bfloat16 to halve
    the output store bytes (the binding path on that chip)."""
    f32 = jnp.float32
    z = jnp.asarray(z, f32)
    B, latent_dim = z.shape
    assert latent_dim == prep["latent_dim"]
    hidden = prep["hidden"]
    n_out = prep["input_size"]
    i_pad = prep["i_pad"]
    w1f, b1f, w_cat, b_cat = prep["w1f"], prep["b1f"], prep["w_cat"], prep["b_cat"]
    mxu_bytes = jnp.dtype(prep["mxu_dtype"]).itemsize
    out_bytes = jnp.dtype(out_dtype).itemsize

    # exp(scale_factor) precomputed outside the kernel (tiny (B,1) op).
    sf = jnp.asarray(scale_factor, f32).reshape(-1, 1)
    esf = jnp.broadcast_to(jnp.exp(sf), (B, 1))

    # ---- per-generation VMEM budget & batch-tile selection -------------------
    try:
        vmem_cap = int(pltpu.get_tpu_info().vmem_capacity_bytes)
    except Exception:
        vmem_cap = 64 * 2**20                      # conservative (v7x-sized) fallback
    vmem_budget = int(0.72 * vmem_cap)             # ~46 MiB on v7x, ~92 MiB on v5e/v6e

    weight_bytes = (w1f.size + w_cat.size) * mxu_bytes + (b1f.size + b_cat.size) * 4

    def _tile_bytes(t):
        io_in = t * latent_dim * 4 + t * 4                      # z tile + exp(sf) tile
        io_out = 3 * t * n_out * out_bytes                      # three output tiles
        interm = t * hidden * 4 + 2 * t * 2 * i_pad * 4         # latent + sr/e temporaries
        return 2 * (io_in + io_out) + interm                    # I/O tiles are double-buffered

    # >=2 grid steps once B is large enough (keeps both v7x TensorCores busy);
    # no batch padding: tb never exceeds B and the last partial block is masked.
    tb = min(batch_tile, max(128, _round_up(_cdiv(B, 2), 16)))
    tb = min(tb, B)
    if tb >= 16:
        tb = (tb // 16) * 16                       # bf16-friendly sublane multiple
    while tb > 16 and weight_bytes + _tile_bytes(tb) > vmem_budget:
        tb = max(16, (tb // 2 // 16) * 16)
    # TODO(synk): add a feature-axis ("arbitrary") grid + online softmax for decoders
    #             whose resident weights alone exceed the VMEM budget (huge hidden*input_size).

    grid = (_cdiv(B, tb),)
    out_shape = tuple(jax.ShapeDtypeStruct((B, n_out), out_dtype) for _ in range(3))

    flops = 2 * B * (latent_dim * hidden + hidden * 2 * i_pad)
    transcendentals = B * (i_pad + n_out + 1)
    bytes_accessed = (z.size * 4 + B * 4 + weight_bytes + 3 * B * n_out * out_bytes)

    kernel = functools.partial(decoder_lognorm_nb_kernel, i_pad=i_pad, n_out=n_out)

    def _call(single_buffer_weights):
        def wspec(shape):
            # Constant-index weights: single-buffer them to halve resident VMEM.
            if single_buffer_weights:
                return pl.BlockSpec(shape, lambda i: (0, 0),
                                    pipeline_mode=pl.Buffered(1))
            return pl.BlockSpec(shape, lambda i: (0, 0))

        in_specs = [
            pl.BlockSpec((tb, latent_dim), lambda i: (i, 0)),   # z tile
            wspec((latent_dim, hidden)),                        # folded w1 (resident)
            wspec((1, hidden)),                                 # folded b1
            wspec((hidden, 2 * i_pad)),                         # [w_scale | w_r] (resident)
            wspec((1, 2 * i_pad)),                              # [b_scale(-1e30 pad) | b_r]
            pl.BlockSpec((tb, 1), lambda i: (i, 0)),            # exp(scale_factor) tile
        ]
        out_spec = pl.BlockSpec((tb, n_out), lambda i: (i, 0))
        return pl.pallas_call(
            kernel,
            out_shape=out_shape,
            grid=grid,
            in_specs=in_specs,
            out_specs=(out_spec, out_spec, out_spec),
            compiler_params=pltpu.CompilerParams(
                dimension_semantics=("parallel",),   # megacore-shard batch tiles
                vmem_limit_bytes=int(vmem_budget),
            ),
            cost_estimate=pl.CostEstimate(
                flops=int(flops),
                transcendentals=int(transcendentals),
                bytes_accessed=int(bytes_accessed),
            ),
        )(z, w1f, b1f, w_cat, b_cat, esf)

    try:
        normalized, disper, scale_x = _call(True)
    except Exception:
        # Fallback for Pallas builds without pipeline_mode=/Buffered(1) support:
        # weights keep a constant index, so they are still not re-DMA'd per step.
        normalized, disper, scale_x = _call(False)

    return dict(normalized=normalized, disperation=disper, scale_x=scale_x)


# ----------------------------------------------------------------------------
# Reference + demo
# ----------------------------------------------------------------------------
def init_params(key, latent_dim, hidden, input_size):
    k = jax.random.split(key, 8)
    return {
        # decoder layer 0: Linear(latent_dim -> hidden), stored (in, out)
        "w1": 0.1 * jax.random.normal(k[0], (latent_dim, hidden), jnp.float32),
        "b1": 0.01 * jax.random.normal(k[1], (1, hidden), jnp.float32),
        # BatchNorm1d(hidden) eval-mode params / running stats
        "bn_gamma": 1.0 + 0.1 * jax.random.normal(k[2], (1, hidden), jnp.float32),
        "bn_beta": 0.05 * jax.random.normal(k[3], (1, hidden), jnp.float32),
        "bn_mean": 0.02 * jax.random.normal(k[4], (1, hidden), jnp.float32),
        "bn_var": 1.0 + 0.1 * jnp.abs(jax.random.normal(k[5], (1, hidden), jnp.float32)),
        # decoder_scale: Linear(hidden -> input_size)
        "w_scale": 0.1 * jax.random.normal(k[6], (hidden, input_size), jnp.float32),
        "b_scale": jnp.zeros((1, input_size), jnp.float32),
        # decoder_r: Linear(hidden -> input_size)
        "w_r": 0.1 * jax.random.normal(k[7], (hidden, input_size), jnp.float32),
        "b_r": jnp.zeros((1, input_size), jnp.float32),
    }


def reference_forward(z, scale_factor, p):
    h = z @ p["w1"] + p["b1"]
    h = (h - p["bn_mean"]) / jnp.sqrt(p["bn_var"] + BN_EPS) * p["bn_gamma"] + p["bn_beta"]
    latent = jnp.maximum(h, 0.0)
    s = latent @ p["w_scale"] + p["b_scale"]
    normalized = jax.nn.softmax(s, axis=1)
    disper = jnp.exp(latent @ p["w_r"] + p["b_r"])
    scale_x = jnp.exp(scale_factor) * normalized
    return dict(normalized=normalized, disperation=disper, scale_x=scale_x)


if __name__ == "__main__":
    B, LATENT, HIDDEN, INPUT = 8, 8, 32, 64

    key = jax.random.PRNGKey(0)
    kz, ksf, kp = jax.random.split(key, 3)

    z = jax.random.normal(kz, (B, LATENT), jnp.float32)
    # scale_factor resized to (batch, 1) as in the PyTorch forward
    scale_factor = 0.5 * jax.random.normal(ksf, (B, 1), jnp.float32)
    params = init_params(kp, LATENT, HIDDEN, INPUT)

    ref = reference_forward(z, scale_factor, params)

    # f32 MXU path: tight correctness check.
    prep32 = prepare_decoder_params(params, use_bf16=False)
    out32 = decoder_lognorm_nb_forward(z, scale_factor, prep32)
    jax.block_until_ready(out32)
    for name in ("normalized", "disperation", "scale_x"):
        assert out32[name].shape == ref[name].shape, name
        assert jnp.allclose(out32[name], ref[name], atol=5e-4, rtol=1e-2), name

    # bf16 MXU path (default): relaxed check vs the f32 reference.
    prep16 = prepare_decoder_params(params, use_bf16=True)
    out16 = decoder_lognorm_nb_forward(z, scale_factor, prep16)
    jax.block_until_ready(out16)
    for name in ("normalized", "disperation", "scale_x"):
        assert jnp.allclose(out16[name], ref[name], atol=5e-3, rtol=5e-2), name

    print("KERNEL_OK")
</pallas_src>

<mosaic_0001>
module attributes {stable_mosaic.version = 11 : i64} {
  func.func @decoder_lognorm_nb_kernel(%arg0: i32, %arg1: memref<8x8xf32, #tpu.memory_space<vmem>>, %arg2: memref<8x32xf32, #tpu.memory_space<vmem>>, %arg3: memref<1x32xf32, #tpu.memory_space<vmem>>, %arg4: memref<32x256xf32, #tpu.memory_space<vmem>>, %arg5: memref<1x256xf32, #tpu.memory_space<vmem>>, %arg6: memref<8x1xf32, #tpu.memory_space<vmem>>, %arg7: memref<8x64xf32, #tpu.memory_space<vmem>>, %arg8: memref<8x64xf32, #tpu.memory_space<vmem>>, %arg9: memref<8x64xf32, #tpu.memory_space<vmem>>) attributes {dimension_semantics = [#tpu.dimension_semantics<parallel>], iteration_bounds = array<i64: 1>, scalar_prefetch = 0 : i64, scratch_operands = 0 : i64, tpu.core_type = #tpu.core_type<tc>, window_params = [{transform_indices = @transform_0, window_bounds = array<i64: 8, 8>}, {pipeline_mode = #tpu.pipeline_mode<synchronous>, transform_indices = @transform_1, window_bounds = array<i64: 8, 32>}, {pipeline_mode = #tpu.pipeline_mode<synchronous>, transform_indices = @transform_2, window_bounds = array<i64: 1, 32>}, {pipeline_mode = #tpu.pipeline_mode<synchronous>, transform_indices = @transform_3, window_bounds = array<i64: 32, 256>}, {pipeline_mode = #tpu.pipeline_mode<synchronous>, transform_indices = @transform_4, window_bounds = array<i64: 1, 256>}, {transform_indices = @transform_5, window_bounds = array<i64: 8, 1>}, {transform_indices = @transform_6, window_bounds = array<i64: 8, 64>}, {transform_indices = @transform_7, window_bounds = array<i64: 8, 64>}, {transform_indices = @transform_8, window_bounds = array<i64: 8, 64>}]} {
    %c0 = arith.constant 0 : index
    %c0_0 = arith.constant 0 : index
    %0 = vector.load %arg1[%c0, %c0_0] : memref<8x8xf32, #tpu.memory_space<vmem>>, vector<8x8xf32>
    %c0_1 = arith.constant 0 : index
    %c0_2 = arith.constant 0 : index
    %1 = vector.load %arg2[%c0_1, %c0_2] : memref<8x32xf32, #tpu.memory_space<vmem>>, vector<8x32xf32>
    %cst = arith.constant dense<0.000000e+00> : vector<8x32xf32>
    %2 = tpu.matmul %0, %1, %cst {dimension_numbers = #tpu.dot_dimension_numbers<[1], [0], [0], [1], [0, 0, 1, 1], [], []>} : vector<8x8xf32>, vector<8x32xf32>, vector<8x32xf32> -> vector<8x32xf32>
    %c0_3 = arith.constant 0 : index
    %c0_4 = arith.constant 0 : index
    %3 = vector.load %arg3[%c0_3, %c0_4] : memref<1x32xf32, #tpu.memory_space<vmem>>, vector<1x32xf32>
    %4 = vector.broadcast %3 : vector<1x32xf32> to vector<8x32xf32>
    %5 = arith.addf %2, %4 : vector<8x32xf32>
    %cst_5 = arith.constant 0.000000e+00 : f32
    %6 = vector.broadcast %cst_5 : f32 to vector<8x32xf32>
    %7 = arith.maximumf %5, %6 : vector<8x32xf32>
    %c0_6 = arith.constant 0 : index
    %c0_7 = arith.constant 0 : index
    %8 = vector.load %arg4[%c0_6, %c0_7] : memref<32x256xf32, #tpu.memory_space<vmem>>, vector<32x256xf32>
    %cst_8 = arith.constant dense<0.000000e+00> : vector<8x256xf32>
    %9 = tpu.matmul %7, %8, %cst_8 {dimension_numbers = #tpu.dot_dimension_numbers<[1], [0], [0], [1], [0, 0, 1, 1], [], []>} : vector<8x32xf32>, vector<32x256xf32>, vector<8x256xf32> -> vector<8x256xf32>
    %c0_9 = arith.constant 0 : index
    %c0_10 = arith.constant 0 : index
    %10 = vector.load %arg5[%c0_9, %c0_10] : memref<1x256xf32, #tpu.memory_space<vmem>>, vector<1x256xf32>
    %11 = vector.broadcast %10 : vector<1x256xf32> to vector<8x256xf32>
    %12 = arith.addf %9, %11 : vector<8x256xf32>
    %13 = vector.extract_strided_slice %12 {offsets = [0, 0], sizes = [8, 128], strides = [1, 1]} : vector<8x256xf32> to vector<8x128xf32>
    %14 = vector.extract_strided_slice %12 {offsets = [0, 128], sizes = [8, 128], strides = [1, 1]} : vector<8x256xf32> to vector<8x128xf32>
    %cst_11 = arith.constant dense<0xFF800000> : vector<8xf32>
    %15 = vector.multi_reduction <maximumf>, %13, %cst_11 [1] : vector<8x128xf32> to vector<8xf32>
    %16 = vector.shape_cast %15 : vector<8xf32> to vector<8x1xf32>
    %17 = vector.broadcast %16 : vector<8x1xf32> to vector<8x128xf32>
    %18 = arith.subf %13, %17 : vector<8x128xf32>
    %19 = math.exp %18 : vector<8x128xf32>
    %cst_12 = arith.constant dense<0.000000e+00> : vector<8xf32>
    %20 = vector.multi_reduction <add>, %19, %cst_12 [1] : vector<8x128xf32> to vector<8xf32>
    %21 = vector.shape_cast %20 : vector<8xf32> to vector<8x1xf32>
    %22 = tpu.reciprocal %21 {approx = true} : vector<8x1xf32> -> vector<8x1xf32>
    %23 = arith.mulf %21, %22 : vector<8x1xf32>
    %cst_13 = arith.constant 2.000000e+00 : f32
    %24 = vector.broadcast %cst_13 : f32 to vector<8x1xf32>
    %25 = arith.subf %24, %23 : vector<8x1xf32>
    %26 = arith.mulf %22, %25 : vector<8x1xf32>
    %27 = vector.broadcast %26 : vector<8x1xf32> to vector<8x128xf32>
    %28 = arith.mulf %19, %27 : vector<8x128xf32>
    %29 = vector.extract_strided_slice %28 {offsets = [0, 0], sizes = [8, 64], strides = [1, 1]} : vector<8x128xf32> to vector<8x64xf32>
    %c0_14 = arith.constant 0 : index
    %c0_15 = arith.constant 0 : index
    %30 = vector.load %arg7[%c0_14, %c0_15] : memref<8x64xf32, #tpu.memory_space<vmem>>, vector<8x64xf32>
    tpu.vector_store %arg7[%c0_14, %c0_15], %29 {strides = array<i32>} : memref<8x64xf32, #tpu.memory_space<vmem>>, vector<8x64xf32>,
    %31 = vector.extract_strided_slice %14 {offsets = [0, 0], sizes = [8, 64], strides = [1, 1]} : vector<8x128xf32> to vector<8x64xf32>
    %32 = math.exp %31 : vector<8x64xf32>
    %c0_16 = arith.constant 0 : index
    %c0_17 = arith.constant 0 : index
    %33 = vector.load %arg8[%c0_16, %c0_17] : memref<8x64xf32, #tpu.memory_space<vmem>>, vector<8x64xf32>
    tpu.vector_store %arg8[%c0_16, %c0_17], %32 {strides = array<i32>} : memref<8x64xf32, #tpu.memory_space<vmem>>, vector<8x64xf32>,
    %c0_18 = arith.constant 0 : index
    %c0_19 = arith.constant 0 : index
    %34 = vector.load %arg6[%c0_18, %c0_19] : memref<8x1xf32, #tpu.memory_space<vmem>>, vector<8x1xf32>
    %35 = vector.broadcast %34 : vector<8x1xf32> to vector<8x64xf32>
    %36 = arith.mulf %35, %29 : vector<8x64xf32>
    %c0_20 = arith.constant 0 : index
    %c0_21 = arith.constant 0 : index
    %37 = vector.load %arg9[%c0_20, %c0_21] : memref<8x64xf32, #tpu.memory_space<vmem>>, vector<8x64xf32>
    tpu.vector_store %arg9[%c0_20, %c0_21], %36 {strides = array<i32>} : memref<8x64xf32, #tpu.memory_space<vmem>>, vector<8x64xf32>,
    return
  }
  func.func @transform_0(%arg0: i32) -> (i32, i32) {
    %c0_i32 = arith.constant 0 : i32
    %c0_i32_0 = arith.constant 0 : i32
    return %arg0, %c0_i32 : i32, i32
  }
  func.func @transform_1(%arg0: i32) -> (i32, i32) {
    %c0_i32 = arith.constant 0 : i32
    %c0_i32_0 = arith.constant 0 : i32
    %c0_i32_1 = arith.constant 0 : i32
    return %c0_i32, %c0_i32_0 : i32, i32
  }
  func.func @transform_2(%arg0: i32) -> (i32, i32) {
    %c0_i32 = arith.constant 0 : i32
    %c0_i32_0 = arith.constant 0 : i32
    %c0_i32_1 = arith.constant 0 : i32
    return %c0_i32, %c0_i32_0 : i32, i32
  }
  func.func @transform_3(%arg0: i32) -> (i32, i32) {
    %c0_i32 = arith.constant 0 : i32
    %c0_i32_0 = arith.constant 0 : i32
    %c0_i32_1 = arith.constant 0 : i32
    return %c0_i32, %c0_i32_0 : i32, i32
  }
  func.func @transform_4(%arg0: i32) -> (i32, i32) {
    %c0_i32 = arith.constant 0 : i32
    %c0_i32_0 = arith.constant 0 : i32
    %c0_i32_1 = arith.constant 0 : i32
    return %c0_i32, %c0_i32_0 : i32, i32
  }
  func.func @transform_5(%arg0: i32) -> (i32, i32) {
    %c0_i32 = arith.constant 0 : i32
    %c0_i32_0 = arith.constant 0 : i32
    return %arg0, %c0_i32 : i32, i32
  }
  func.func @transform_6(%arg0: i32) -> (i32, i32) {
    %c0_i32 = arith.constant 0 : i32
    %c0_i32_0 = arith.constant 0 : i32
    return %arg0, %c0_i32 : i32, i32
  }
  func.func @transform_7(%arg0: i32) -> (i32, i32) {
    %c0_i32 = arith.constant 0 : i32
    %c0_i32_0 = arith.constant 0 : i32
    return %arg0, %c0_i32 : i32, i32
  }
  func.func @transform_8(%arg0: i32) -> (i32, i32) {
    %c0_i32 = arith.constant 0 : i32
    %c0_i32_0 = arith.constant 0 : i32
    return %arg0, %c0_i32 : i32, i32
  }
}

module attributes {stable_mosaic.version = 11 : i64} {
  func.func @decoder_lognorm_nb_kernel(%arg0: i32, %arg1: memref<8x8xf32, #tpu.memory_space<vmem>>, %arg2: memref<8x32xf32, #tpu.memory_space<vmem>>, %arg3: memref<1x32xf32, #tpu.memory_space<vmem>>, %arg4: memref<32x256xf32, #tpu.memory_space<vmem>>, %arg5: memref<1x256xf32, #tpu.memory_space<vmem>>, %arg6: memref<8x1xf32, #tpu.memory_space<vmem>>, %arg7: memref<8x64xf32, #tpu.memory_space<vmem>>, %arg8: memref<8x64xf32, #tpu.memory_space<vmem>>, %arg9: memref<8x64xf32, #tpu.memory_space<vmem>>) attributes {dimension_semantics = [#tpu.dimension_semantics<parallel>], iteration_bounds = array<i64: 1>, scalar_prefetch = 0 : i64, scratch_operands = 0 : i64, tpu.core_type = #tpu.core_type<tc>, window_params = [{transform_indices = @transform_0, window_bounds = array<i64: 8, 8>}, {pipeline_mode = #tpu.pipeline_mode<synchronous>, transform_indices = @transform_1, window_bounds = array<i64: 8, 32>}, {pipeline_mode = #tpu.pipeline_mode<synchronous>, transform_indices = @transform_2, window_bounds = array<i64: 1, 32>}, {pipeline_mode = #tpu.pipeline_mode<synchronous>, transform_indices = @transform_3, window_bounds = array<i64: 32, 256>}, {pipeline_mode = #tpu.pipeline_mode<synchronous>, transform_indices = @transform_4, window_bounds = array<i64: 1, 256>}, {transform_indices = @transform_5, window_bounds = array<i64: 8, 1>}, {transform_indices = @transform_6, window_bounds = array<i64: 8, 64>}, {transform_indices = @transform_7, window_bounds = array<i64: 8, 64>}, {transform_indices = @transform_8, window_bounds = array<i64: 8, 64>}]} {
    %c0 = arith.constant 0 : index
    %c0_0 = arith.constant 0 : index
    %0 = vector.load %arg1[%c0, %c0_0] : memref<8x8xf32, #tpu.memory_space<vmem>>, vector<8x8xf32>
    %c0_1 = arith.constant 0 : index
    %c0_2 = arith.constant 0 : index
    %1 = vector.load %arg2[%c0_1, %c0_2] : memref<8x32xf32, #tpu.memory_space<vmem>>, vector<8x32xf32>
    %cst = arith.constant dense<0.000000e+00> : vector<8x32xf32>
    %2 = tpu.matmul %0, %1, %cst {dimension_numbers = #tpu.dot_dimension_numbers<[1], [0], [0], [1], [0, 0, 1, 1], [], []>} : vector<8x8xf32>, vector<8x32xf32>, vector<8x32xf32> -> vector<8x32xf32>
    %c0_3 = arith.constant 0 : index
    %c0_4 = arith.constant 0 : index
    %3 = vector.load %arg3[%c0_3, %c0_4] : memref<1x32xf32, #tpu.memory_space<vmem>>, vector<1x32xf32>
    %4 = vector.broadcast %3 : vector<1x32xf32> to vector<8x32xf32>
    %5 = arith.addf %2, %4 : vector<8x32xf32>
    %cst_5 = arith.constant 0.000000e+00 : f32
    %6 = vector.broadcast %cst_5 : f32 to vector<8x32xf32>
    %7 = arith.maximumf %5, %6 : vector<8x32xf32>
    %c0_6 = arith.constant 0 : index
    %c0_7 = arith.constant 0 : index
    %8 = vector.load %arg4[%c0_6, %c0_7] : memref<32x256xf32, #tpu.memory_space<vmem>>, vector<32x256xf32>
    %cst_8 = arith.constant dense<0.000000e+00> : vector<8x256xf32>
    %9 = tpu.matmul %7, %8, %cst_8 {dimension_numbers = #tpu.dot_dimension_numbers<[1], [0], [0], [1], [0, 0, 1, 1], [], []>} : vector<8x32xf32>, vector<32x256xf32>, vector<8x256xf32> -> vector<8x256xf32>
    %c0_9 = arith.constant 0 : index
    %c0_10 = arith.constant 0 : index
    %10 = vector.load %arg5[%c0_9, %c0_10] : memref<1x256xf32, #tpu.memory_space<vmem>>, vector<1x256xf32>
    %11 = vector.broadcast %10 : vector<1x256xf32> to vector<8x256xf32>
    %12 = arith.addf %9, %11 : vector<8x256xf32>
    %13 = vector.extract_strided_slice %12 {offsets = [0, 0], sizes = [8, 128], strides = [1, 1]} : vector<8x256xf32> to vector<8x128xf32>
    %14 = vector.extract_strided_slice %12 {offsets = [0, 128], sizes = [8, 128], strides = [1, 1]} : vector<8x256xf32> to vector<8x128xf32>
    %cst_11 = arith.constant dense<0xFF800000> : vector<8xf32>
    %15 = vector.multi_reduction <maximumf>, %13, %cst_11 [1] : vector<8x128xf32> to vector<8xf32>
    %16 = vector.shape_cast %15 : vector<8xf32> to vector<8x1xf32>
    %17 = vector.broadcast %16 : vector<8x1xf32> to vector<8x128xf32>
    %18 = arith.subf %13, %17 : vector<8x128xf32>
    %19 = math.exp %18 : vector<8x128xf32>
    %cst_12 = arith.constant dense<0.000000e+00> : vector<8xf32>
    %20 = vector.multi_reduction <add>, %19, %cst_12 [1] : vector<8x128xf32> to vector<8xf32>
    %21 = vector.shape_cast %20 : vector<8xf32> to vector<8x1xf32>
    %22 = tpu.reciprocal %21 {approx = true} : vector<8x1xf32> -> vector<8x1xf32>
    %23 = arith.mulf %21, %22 : vector<8x1xf32>
    %cst_13 = arith.constant 2.000000e+00 : f32
    %24 = vector.broadcast %cst_13 : f32 to vector<8x1xf32>
    %25 = arith.subf %24, %23 : vector<8x1xf32>
    %26 = arith.mulf %22, %25 : vector<8x1xf32>
    %27 = vector.broadcast %26 : vector<8x1xf32> to vector<8x128xf32>
    %28 = arith.mulf %19, %27 : vector<8x128xf32>
    %29 = vector.extract_strided_slice %28 {offsets = [0, 0], sizes = [8, 64], strides = [1, 1]} : vector<8x128xf32> to vector<8x64xf32>
    %c0_14 = arith.constant 0 : index
    %c0_15 = arith.constant 0 : index
    %30 = vector.load %arg7[%c0_14, %c0_15] : memref<8x64xf32, #tpu.memory_space<vmem>>, vector<8x64xf32>
    tpu.vector_store %arg7[%c0_14, %c0_15], %29 {strides = array<i32>} : memref<8x64xf32, #tpu.memory_space<vmem>>, vector<8x64xf32>,
    %31 = vector.extract_strided_slice %14 {offsets = [0, 0], sizes = [8, 64], strides = [1, 1]} : vector<8x128xf32> to vector<8x64xf32>
    %32 = math.exp %31 : vector<8x64xf32>
    %c0_16 = arith.constant 0 : index
    %c0_17 = arith.constant 0 : index
    %33 = vector.load %arg8[%c0_16, %c0_17] : memref<8x64xf32, #tpu.memory_space<vmem>>, vector<8x64xf32>
    tpu.vector_store %arg8[%c0_16, %c0_17], %32 {strides = array<i32>} : memref<8x64xf32, #tpu.memory_space<vmem>>, vector<8x64xf32>,
    %c0_18 = arith.constant 0 : index
    %c0_19 = arith.constant 0 : index
    %34 = vector.load %arg6[%c0_18, %c0_19] : memref<8x1xf32, #tpu.memory_space<vmem>>, vector<8x1xf32>
    %35 = vector.broadcast %34 : vector<8x1xf32> to vector<8x64xf32>
    %36 = arith.mulf %35, %29 : vector<8x64xf32>
    %c0_20 = arith.constant 0 : index
    %c0_21 = arith.constant 0 : index
    %37 = vector.load %arg9[%c0_20, %c0_21] : memref<8x64xf32, #tpu.memory_space<vmem>>, vector<8x64xf32>
    tpu.vector_store %arg9[%c0_20, %c0_21], %36 {strides = array<i32>} : memref<8x64xf32, #tpu.memory_space<vmem>>, vector<8x64xf32>,
    return
  }
  func.func @transform_0(%arg0: i32) -> (i32, i32) {
    %c0_i32 = arith.constant 0 : i32
    %c0_i32_0 = arith.constant 0 : i32
    return %arg0, %c0_i32 : i32, i32
  }
  func.func @transform_1(%arg0: i32) -> (i32, i32) {
    %c0_i32 = arith.constant 0 : i32
    %c0_i32_0 = arith.constant 0 : i32
    %c0_i32_1 = arith.constant 0 : i32
    return %c0_i32, %c0_i32_0 : i32, i32
  }
  func.func @transform_2(%arg0: i32) -> (i32, i32) {
    %c0_i32 = arith.constant 0 : i32
    %c0_i32_0 = arith.constant 0 : i32
    %c0_i32_1 = arith.constant 0 : i32
    return %c0_i32, %c0_i32_0 : i32, i32
  }
  func.func @transform_3(%arg0: i32) -> (i32, i32) {
    %c0_i32 = arith.constant 0 : i32
    %c0_i32_0 = arith.constant 0 : i32
    %c0_i32_1 = arith.constant 0 : i32
    return %c0_i32, %c0_i32_0 : i32, i32
  }
  func.func @transform_4(%arg0: i32) -> (i32, i32) {
    %c0_i32 = arith.constant 0 : i32
    %c0_i32_0 = arith.constant 0 : i32
    %c0_i32_1 = arith.constant 0 : i32
    return %c0_i32, %c0_i32_0 : i32, i32
  }
  func.func @transform_5(%arg0: i32) -> (i32, i32) {
    %c0_i32 = arith.constant 0 : i32
    %c0_i32_0 = arith.constant 0 : i32
    return %arg0, %c0_i32 : i32, i32
  }
  func.func @transform_6(%arg0: i32) -> (i32, i32) {
    %c0_i32 = arith.constant 0 : i32
    %c0_i32_0 = arith.constant 0 : i32
    return %arg0, %c0_i32 : i32, i32
  }
  func.func @transform_7(%arg0: i32) -> (i32, i32) {
    %c0_i32 = arith.constant 0 : i32
    %c0_i32_0 = arith.constant 0 : i32
    return %arg0, %c0_i32 : i32, i32
  }
  func.func @transform_8(%arg0: i32) -> (i32, i32) {
    %c0_i32 = arith.constant 0 : i32
    %c0_i32_0 = arith.constant 0 : i32
    return %arg0, %c0_i32 : i32, i32
  }
}

</mosaic_0001>

<bundles_post_ra>
// kernel: tpu_custom_call.1
= control target key start
LH: loop header
LB: loop body
LE: loop exit
PB: predicated region body
PF: predicated region fallthrough
CT: control target
= control target key end

     0   :  { %14 = vsyncpa [#allocation3], 0  ;;  %s592_s0 = inlined_call_operand.vmem [shape: f32[8,8], index: 0, kind: input, shape index: {}]   ;;  %s593_s1 = inlined_call_operand.hbm [shape: f32[8,32], index: 1, kind: input, shape index: {}]   ;;  %s594_s2 = inlined_call_operand.vmem [shape: f32[1,32], index: 2, kind: input, shape index: {}]   ;;  %s595_s3 = inlined_call_operand.hbm [shape: f32[32,256], index: 3, kind: input, shape index: {}]   ;;  %s596_s4 = inlined_call_operand.vmem [shape: f32[1,256], index: 4, kind: input, shape index: {}]   ;;  %s597_s5 = inlined_call_operand.vmem [shape: f32[8,1], index: 5, kind: input, shape index: {}]   ;;  %s598_s6 = inlined_call_operand.hbm [shape: f32[8,64], index: 6, kind: output, shape index: {0}]   ;;  %s599_s7 = inlined_call_operand.hbm [shape: f32[8,64], index: 7, kind: output, shape index: {1}]   ;;  %s600_s8 = inlined_call_operand.hbm [shape: f32[8,64], index: 8, kind: output, shape index: {2}]  }
   0x1   :  { %15 = vsyncpa [#allocation6], 0 }
   0x2   :  { %16 = vsyncpa [#allocation4], 0 }
   0x3   :  { %17 = vsyncpa [#allocation9], 0  ;;  %s455_s27 = smov [#allocation2]   ;;  %s456_s29 = smov [#allocation5]  }
   0x4   :  { %s26_s28 = sshll.u32 %s455_s27, 4  ;;  %s37_s30 = sshll.u32 %s456_s29, 4  ;;  %s27_s28 = int_to_ptr.vmem [resolvable:$true] %s26_s28  ;;  %s510_s30 = int_to_ptr.vmem [resolvable:$true] %s37_s30 }
   0x5   :  { %s337_s11 = scalar_lea.hbm %s593_s1, 128 }
   0x6   :  { %p338_p0 = scmp.ne.s32.totalorder %s593_s1, %s337_s11  ;;  %p341_p1 = scmp.lt.u32.totalorder %s337_s11, %s593_s1 }
   0x8   :  { %p343_p2 = pnand %p341_p1, %p338_p0 }
   0xa   :  { %346 = shalt.err (!%p343_p2)
}
   0xb   :  { %s347_s16 = scalar_lea.vmem %s27_s28, 128  ;;  %p352_p4 = scmp.lt.s32.totalorder %s27_s28, %s27_s28 }
   0xc   :  { %p348_p3 = scmp.ne.s32.totalorder %s27_s28, %s347_s16  ;;  %p353_p5 = scmp.lt.s32.totalorder %s347_s16, %s347_s16 }
   0xe   :  { %p354_p6 = por %p353_p5, %p352_p4 }
  0x10   :  { %p355_p7 = pnand %p354_p6, %p348_p3 }
  0x12   :  { %358 = shalt.err (!%p355_p7)
}
  0x13   :  { %29 = dma.hbm_to_vmem [thread:$0]  %s593_s1, 128, %s27_s28, [#allocation3]  }
  0x14   :  { %s359_s21 = scalar_lea.hbm %s595_s3, 1024 }
  0x15   :  { %p360_p8 = scmp.ne.s32.totalorder %s595_s3, %s359_s21  ;;  %p363_p9 = scmp.lt.u32.totalorder %s359_s21, %s595_s3 }
  0x17   :  { %p365_p10 = pnand %p363_p9, %p360_p8 }
  0x19   :  { %368 = shalt.err (!%p365_p10)
}
  0x1a   :  { %s369_s26 = scalar_lea.vmem %s510_s30, 1024  ;;  %p374_p12 = scmp.lt.s32.totalorder %s510_s30, %s510_s30 }
  0x1b   :  { %p370_p11 = scmp.ne.s32.totalorder %s510_s30, %s369_s26  ;;  %p375_p13 = scmp.lt.s32.totalorder %s369_s26, %s369_s26 }
  0x1d   :  { %p376_p0 = por %p375_p13, %p374_p12 }
  0x1f   :  { %p377_p1 = pnand %p376_p0, %p370_p11 }
  0x21   :  { %380 = shalt.err (!%p377_p1)
}
  0x22   :  { %s457_s1 = smov 256   ;;  %s458_s27 = smov 16  }
  0x23   :  { %43 = dma.hbm_to_vmem [thread:$0]  %s595_s3, 1024, %s510_s30, [#allocation6], %s457_s1, %s457_s1, %s458_s27  }
  0x24   :  { %447 = dma.done.wait [#allocation3], 128  }
  0x25   :  { %448 = vsyncadd [#allocation3], 4294967168 }
  0x26   :  { %449 = dma.done.wait [#allocation6], 1024  }
  0x27   :  { %450 = vsyncadd [#allocation6], 4294966272  ;;  %v459_v0 = vmov 0.0   ;;  %vm460_vm0 = vmmov 0   ;;  %vm63_vm1 = vcmask 64512   ;;  %v55_v1 = vld [vmem:[#allocation2] sm:$0xff]  ;;  %v148_v20 = vlaneseq }
  0x28   :  { %306 = vmatprep.subr.mxu0 %v459_v0  ;;  %308 = vmatprep.mubr.msk.f32.mxu0 %vm460_vm0, %v459_v0  ;;  %v54_v2 = vld [vmem:[%s592_s0] sm:$0xff]  ;;  %v139_v3 = vld [vmem:[#allocation5 + $0x8] sm:$0xff]  ;;  %v138_v5 = vld [vmem:[#allocation5] sm:$0xff]  ;;  %vm158_vm2 = vcmask 261120   ;;  %vm245_vm3 = vcmask 523264   ;;  %v461_v34 = vmov 0  }
  0x29   :  { %226 = vmatprep.mubr.f32.mxu1 %v459_v0  ;;  %307 = vmatpush3.msra.mxu0 %v55_v1  ;;  %v141_v4 = vld [vmem:[#allocation5 + $0x18] sm:$0xff]  ;;  %v140_v6 = vld [vmem:[#allocation5 + $0x10] sm:$0xff]  ;;  %v143_v9 = vld [vmem:[#allocation5 + $0x28] sm:$0xff]  ;;  %v149_v21 = vshrl.u32 %v148_v20, 7 }
  0x2a   :  { %309 = vmatmul.mubr.msk.f32.vlgmr.msra.gmra.mrb[0].mxu0 %vm63_vm1, %v54_v2  ;;  %v311_v7 = vpack.c.bf16 %v141_v4, %v139_v3  ;;  %v313_v8 = vpack.c.bf16 %v140_v6, %v138_v5  ;;  %v145_v10 = vld [vmem:[#allocation5 + $0x38] sm:$0xff]  ;;  %v142_v12 = vld [vmem:[#allocation5 + $0x20] sm:$0xff]  ;;  %v144_v13 = vld [vmem:[#allocation5 + $0x30] sm:$0xff]  ;;  %329 = vset.pattern.permute.xlu1 %v461_v34 }
  0x2b   :  { %v315_v11 = vpack.c.bf16 %v145_v10, %v143_v9  ;;  %v317_v14 = vpack.c.bf16 %v144_v13, %v142_v12  ;;  %v301_v15 = vld [vmem:[%s594_s2] ss:$0 sm:$0xff]  ;;  %v150_v22 = vsub.s32 0, %v149_v21  ;;  %v154_v24 = vsub.s32 1, %v149_v21  ;;  %330 = vset.pattern.permute.xlu0 %v461_v34 }
  0x2c   :  { %312 = vmatprep.subr.bf16.mxu1 %v311_v7  ;;  %v146_v23 = vld [vmem:[%s596_s4] sm:$0x3]  ;;  %s462_s4 = smov [#allocation8]  }
  0x2d   :  { %314 = vmatpush1.bf16.msra.mxu1 %v313_v8  ;;  %v151_v25 = vrot.slane %v146_v23, %v150_v22  ;;  %v155_v26 = vrot.slane %v146_v23, %v154_v24  ;;  %v250_v33 = vld [vmem:[%s597_s5] sm:$0xff]  ;;  %s274_s13 = sshll.u32 %s462_s4, 4  ;;  %s275_s13 = int_to_ptr.vmem [resolvable:$true] %s274_s13 }
  0x2e   :  { %316 = vmatprep.subr.bf16.mxu1 %v315_v11  ;;  %253 = vperm.xlu1 %329, %v250_v33   ;;  %s381_s14 = scalar_lea.vmem %s275_s13, 128  ;;  %p386_p3 = scmp.lt.s32.totalorder %s275_s13, %s275_s13 }
  0x2f   :  { %p382_p2 = scmp.ne.s32.totalorder %s275_s13, %s381_s14  ;;  %p387_p4 = scmp.lt.s32.totalorder %s381_s14, %s381_s14 }
  0x31   :  { %318 = vmatpush1.bf16.msra.mxu1 %v317_v14  ;;  %p388_p5 = por %p387_p4, %p386_p3 }
  0x33   :  { %p389_p6 = pnand %p388_p5, %p382_p2 }
  0xfd   :  { %v133_v16 = vpop.f32.mrb[0].mxu0 }
  0xfe   :  { %v134_v17 = vadd.f32 %v301_v15, %v133_v16  ;;  %v310_v18 = vpop.f32.mrb[1].mxu0 }
 0x100   :  { %v137_v19 = vmax.f32 %v134_v17, 0.0 }
 0x102   :  { %303 = vmatmul.mubr.msk.f32.vlgmr.msra.gmra.mrb[0].mxu1 %vm158_vm2, %v137_v19 }
 0x1d5   :  { %v228_v27 = vpop.f32.mrb[0].mxu1 }
 0x1d6   :  { %v229_v28 = vadd.f32 %v228_v27, %v151_v25  ;;  %v230_v29 = vpop.f32.mrb[1].mxu1 }
 0x1d7   :  { %v231_v30 = vadd.f32 %v230_v29, %v155_v26 }
 0x1d8   :  { %233 = vmax.xlane.f32.xlu0 %v229_v28 }
 0x1d9   :  { %v247_v31 = vmul.f32 1.442695, %v231_v30 }
 0x1db   :  { %331 = vpow2.f32 %v247_v31 }
 0x1e5   :  { %v332_v32 = vpop.eup %331 }
 0x1e6   :  { %249 = vst.msk [vmem:[#allocation8] sm:$0xff] %vm245_vm3, %v332_v32 }
 0x265   :  { %v234_v35 = vpop.xlane.xlu0 %233 }
 0x266   :  { %v235_v36 = vsub.f32 %v229_v28, %v234_v35 }
 0x268   :  { %v236_v37 = vmul.f32 1.442695, %v235_v36 }
 0x26a   :  { %333 = vpow2.f32 %v236_v37 }
 0x274   :  { %v334_v38 = vpop.eup %333 }
 0x275   :  { %238 = vadd.xlane.f32.xlu0 %v334_v38 }
 0x276   :  { %392 = shalt.err (!%p389_p6)
}
 0x277   :  { %s393_s16 = scalar_lea.hbm %s599_s7, 128 }
 0x278   :  { %p394_p7 = scmp.ne.s32.totalorder %s599_s7, %s393_s16  ;;  %p397_p8 = scmp.lt.u32.totalorder %s393_s16, %s599_s7 }
 0x27a   :  { %p399_p9 = pnand %p397_p8, %p394_p7 }
 0x27c   :  { %402 = shalt.err (!%p399_p9)
}
 0x27d   :  { %277 = dma.vmem_to_hbm [thread:$0]  %s275_s13, 128, %s599_s7, [#allocation9]   ;;  %v254_v44 = vpop.permute.xlu1 %253 }
 0x27e   :  { %s463_s23 = smov [#allocation7]   ;;  %s464_s25 = smov [#allocation10]  }
 0x27f   :  { %s264_s24 = sshll.u32 %s463_s23, 4  ;;  %s284_s26 = sshll.u32 %s464_s25, 4  ;;  %s265_s24 = int_to_ptr.vmem [resolvable:$true] %s264_s24  ;;  %s285_s26 = int_to_ptr.vmem [resolvable:$true] %s284_s26 }
 0x280   :  { %s403_s1 = scalar_lea.vmem %s265_s24, 128  ;;  %p408_p11 = scmp.lt.s32.totalorder %s265_s24, %s265_s24 }
 0x281   :  { %p404_p10 = scmp.ne.s32.totalorder %s265_s24, %s403_s1  ;;  %p409_p12 = scmp.lt.s32.totalorder %s403_s1, %s403_s1 }
 0x283   :  { %p410_p13 = por %p409_p12, %p408_p11 }
 0x285   :  { %p411_p0 = pnand %p410_p13, %p404_p10 }
 0x302   :  { %v239_v39 = vpop.xlane.xlu0 %238 }
 0x303   :  { %335 = vrcp.f32 %v239_v39 }
 0x30d   :  { %v336_v40 = vpop.eup %335 }
 0x30e   :  { %v241_v41 = vmul.f32 %v336_v40, %v239_v39 }
 0x310   :  { %v242_v42 = vsub.f32 2.0, %v241_v41 }
 0x312   :  { %v243_v43 = vmul.f32 %v336_v40, %v242_v42 }
 0x314   :  { %v244_v45 = vmul.f32 %v334_v38, %v243_v43 }
 0x316   :  { %v256_v46 = vmul.f32 %v254_v44, %v244_v45  ;;  %246 = vst.msk [vmem:[#allocation7] sm:$0xff] %vm245_vm3, %v244_v45 }
 0x317   :  { %414 = shalt.err (!%p411_p0)
}
 0x318   :  { %s415_s28 = scalar_lea.hbm %s598_s6, 128 }
 0x319   :  { %p416_p1 = scmp.ne.s32.totalorder %s598_s6, %s415_s28  ;;  %p419_p2 = scmp.lt.u32.totalorder %s415_s28, %s598_s6 }
 0x31b   :  { %p421_p3 = pnand %p419_p2, %p416_p1 }
 0x31d   :  { %424 = shalt.err (!%p421_p3)
}
 0x31e   :  { %267 = dma.vmem_to_hbm [thread:$0]  %s265_s24, 128, %s598_s6, [#allocation4]   ;;  %257 = vst.msk [vmem:[#allocation10] sm:$0xff] %vm245_vm3, %v256_v46 }
 0x31f   :  { %s425_s11 = scalar_lea.vmem %s285_s26, 128  ;;  %p430_p5 = scmp.lt.s32.totalorder %s285_s26, %s285_s26 }
 0x320   :  { %p426_p4 = scmp.ne.s32.totalorder %s285_s26, %s425_s11  ;;  %p431_p6 = scmp.lt.s32.totalorder %s425_s11, %s425_s11 }
 0x322   :  { %p432_p7 = por %p431_p6, %p430_p5 }
 0x324   :  { %p433_p8 = pnand %p432_p7, %p426_p4 }
 0x326   :  { %436 = shalt.err (!%p433_p8)
}
 0x327   :  { %s437_s4 = scalar_lea.hbm %s600_s8, 128 }
 0x328   :  { %p438_p9 = scmp.ne.s32.totalorder %s600_s8, %s437_s4  ;;  %p441_p10 = scmp.lt.u32.totalorder %s437_s4, %s600_s8 }
 0x32a   :  { %p443_p11 = pnand %p441_p10, %p438_p9 }
 0x32c   :  { %446 = shalt.err (!%p443_p11)
}
 0x32d   :  { %287 = dma.vmem_to_hbm [thread:$0]  %s285_s26, 128, %s600_s8, [#allocation9]  }
 0x32e   :  { %451 = dma.done.wait [#allocation4], 128  }
 0x32f   :  { %452 = vsyncadd [#allocation4], 4294967168 }
 0x330   :  { %453 = dma.done.wait [#allocation9], 256  }
 0x331   :  { %454 = vsyncadd [#allocation9], 4294967040 }
 0x332   :  { %297 = vsyncpa [#allocation3], 1 }
 0x333   :  { %298 = vsyncpa [#allocation6], 1 }
 0x334   :  { %299 = vsyncpa [#allocation4], 1 }
 0x335   :  { %300 = vsyncpa [#allocation9], 1 }

// kernel: tpu_custom_call.1
= control target key start
LH: loop header
LB: loop body
LE: loop exit
PB: predicated region body
PF: predicated region fallthrough
CT: control target
= control target key end

     0   :  { %14 = vsyncpa [#allocation3], 0  ;;  %s592_s0 = inlined_call_operand.vmem [shape: f32[8,8], index: 0, kind: input, shape index: {}]   ;;  %s593_s1 = inlined_call_operand.hbm [shape: f32[8,32], index: 1, kind: input, shape index: {}]   ;;  %s594_s2 = inlined_call_operand.vmem [shape: f32[1,32], index: 2, kind: input, shape index: {}]   ;;  %s595_s3 = inlined_call_operand.hbm [shape: f32[32,256], index: 3, kind: input, shape index: {}]   ;;  %s596_s4 = inlined_call_operand.vmem [shape: f32[1,256], index: 4, kind: input, shape index: {}]   ;;  %s597_s5 = inlined_call_operand.vmem [shape: f32[8,1], index: 5, kind: input, shape index: {}]   ;;  %s598_s6 = inlined_call_operand.hbm [shape: f32[8,64], index: 6, kind: output, shape index: {0}]   ;;  %s599_s7 = inlined_call_operand.hbm [shape: f32[8,64], index: 7, kind: output, shape index: {1}]   ;;  %s600_s8 = inlined_call_operand.hbm [shape: f32[8,64], index: 8, kind: output, shape index: {2}]  }
   0x1   :  { %15 = vsyncpa [#allocation6], 0 }
   0x2   :  { %16 = vsyncpa [#allocation4], 0 }
   0x3   :  { %17 = vsyncpa [#allocation9], 0  ;;  %s455_s27 = smov [#allocation2]   ;;  %s456_s29 = smov [#allocation5]  }
   0x4   :  { %s26_s28 = sshll.u32 %s455_s27, 4  ;;  %s37_s30 = sshll.u32 %s456_s29, 4  ;;  %s27_s28 = int_to_ptr.vmem [resolvable:$true] %s26_s28  ;;  %s510_s30 = int_to_ptr.vmem [resolvable:$true] %s37_s30 }
   0x5   :  { %s337_s11 = scalar_lea.hbm %s593_s1, 128 }
   0x6   :  { %p338_p0 = scmp.ne.s32.totalorder %s593_s1, %s337_s11  ;;  %p341_p1 = scmp.lt.u32.totalorder %s337_s11, %s593_s1 }
   0x8   :  { %p343_p2 = pnand %p341_p1, %p338_p0 }
   0xa   :  { %346 = shalt.err (!%p343_p2)
}
   0xb   :  { %s347_s16 = scalar_lea.vmem %s27_s28, 128  ;;  %p352_p4 = scmp.lt.s32.totalorder %s27_s28, %s27_s28 }
   0xc   :  { %p348_p3 = scmp.ne.s32.totalorder %s27_s28, %s347_s16  ;;  %p353_p5 = scmp.lt.s32.totalorder %s347_s16, %s347_s16 }
   0xe   :  { %p354_p6 = por %p353_p5, %p352_p4 }
  0x10   :  { %p355_p7 = pnand %p354_p6, %p348_p3 }
  0x12   :  { %358 = shalt.err (!%p355_p7)
}
  0x13   :  { %29 = dma.hbm_to_vmem [thread:$0]  %s593_s1, 128, %s27_s28, [#allocation3]  }
  0x14   :  { %s359_s21 = scalar_lea.hbm %s595_s3, 1024 }
  0x15   :  { %p360_p8 = scmp.ne.s32.totalorder %s595_s3, %s359_s21  ;;  %p363_p9 = scmp.lt.u32.totalorder %s359_s21, %s595_s3 }
  0x17   :  { %p365_p10 = pnand %p363_p9, %p360_p8 }
  0x19   :  { %368 = shalt.err (!%p365_p10)
}
  0x1a   :  { %s369_s26 = scalar_lea.vmem %s510_s30, 1024  ;;  %p374_p12 = scmp.lt.s32.totalorder %s510_s30, %s510_s30 }
  0x1b   :  { %p370_p11 = scmp.ne.s32.totalorder %s510_s30, %s369_s26  ;;  %p375_p13 = scmp.lt.s32.totalorder %s369_s26, %s369_s26 }
  0x1d   :  { %p376_p0 = por %p375_p13, %p374_p12 }
  0x1f   :  { %p377_p1 = pnand %p376_p0, %p370_p11 }
  0x21   :  { %380 = shalt.err (!%p377_p1)
}
  0x22   :  { %s457_s1 = smov 256   ;;  %s458_s27 = smov 16  }
  0x23   :  { %43 = dma.hbm_to_vmem [thread:$0]  %s595_s3, 1024, %s510_s30, [#allocation6], %s457_s1, %s457_s1, %s458_s27  }
  0x24   :  { %447 = dma.done.wait [#allocation3], 128  }
  0x25   :  { %448 = vsyncadd [#allocation3], 4294967168 }
  0x26   :  { %449 = dma.done.wait [#allocation6], 1024  }
  0x27   :  { %450 = vsyncadd [#allocation6], 4294966272  ;;  %v459_v0 = vmov 0.0   ;;  %vm460_vm0 = vmmov 0   ;;  %vm63_vm1 = vcmask 64512   ;;  %v55_v1 = vld [vmem:[#allocation2] sm:$0xff]  ;;  %v148_v20 = vlaneseq }
  0x28   :  { %306 = vmatprep.subr.mxu0 %v459_v0  ;;  %308 = vmatprep.mubr.msk.f32.mxu0 %vm460_vm0, %v459_v0  ;;  %v54_v2 = vld [vmem:[%s592_s0] sm:$0xff]  ;;  %v139_v3 = vld [vmem:[#allocation5 + $0x8] sm:$0xff]  ;;  %v138_v5 = vld [vmem:[#allocation5] sm:$0xff]  ;;  %vm158_vm2 = vcmask 261120   ;;  %vm245_vm3 = vcmask 523264   ;;  %v461_v34 = vmov 0  }
  0x29   :  { %226 = vmatprep.mubr.f32.mxu1 %v459_v0  ;;  %307 = vmatpush3.msra.mxu0 %v55_v1  ;;  %v141_v4 = vld [vmem:[#allocation5 + $0x18] sm:$0xff]  ;;  %v140_v6 = vld [vmem:[#allocation5 + $0x10] sm:$0xff]  ;;  %v143_v9 = vld [vmem:[#allocation5 + $0x28] sm:$0xff]  ;;  %v149_v21 = vshrl.u32 %v148_v20, 7 }
  0x2a   :  { %309 = vmatmul.mubr.msk.f32.vlgmr.msra.gmra.mrb[0].mxu0 %vm63_vm1, %v54_v2  ;;  %v311_v7 = vpack.c.bf16 %v141_v4, %v139_v3  ;;  %v313_v8 = vpack.c.bf16 %v140_v6, %v138_v5  ;;  %v145_v10 = vld [vmem:[#allocation5 + $0x38] sm:$0xff]  ;;  %v142_v12 = vld [vmem:[#allocation5 + $0x20] sm:$0xff]  ;;  %v144_v13 = vld [vmem:[#allocation5 + $0x30] sm:$0xff]  ;;  %329 = vset.pattern.permute.xlu1 %v461_v34 }
  0x2b   :  { %v315_v11 = vpack.c.bf16 %v145_v10, %v143_v9  ;;  %v317_v14 = vpack.c.bf16 %v144_v13, %v142_v12  ;;  %v301_v15 = vld [vmem:[%s594_s2] ss:$0 sm:$0xff]  ;;  %v150_v22 = vsub.s32 0, %v149_v21  ;;  %v154_v24 = vsub.s32 1, %v149_v21  ;;  %330 = vset.pattern.permute.xlu0 %v461_v34 }
  0x2c   :  { %312 = vmatprep.subr.bf16.mxu1 %v311_v7  ;;  %v146_v23 = vld [vmem:[%s596_s4] sm:$0x3]  ;;  %s462_s4 = smov [#allocation8]  }
  0x2d   :  { %314 = vmatpush1.bf16.msra.mxu1 %v313_v8  ;;  %v151_v25 = vrot.slane %v146_v23, %v150_v22  ;;  %v155_v26 = vrot.slane %v146_v23, %v154_v24  ;;  %v250_v33 = vld [vmem:[%s597_s5] sm:$0xff]  ;;  %s274_s13 = sshll.u32 %s462_s4, 4  ;;  %s275_s13 = int_to_ptr.vmem [resolvable:$true] %s274_s13 }
  0x2e   :  { %316 = vmatprep.subr.bf16.mxu1 %v315_v11  ;;  %253 = vperm.xlu1 %329, %v250_v33   ;;  %s381_s14 = scalar_lea.vmem %s275_s13, 128  ;;  %p386_p3 = scmp.lt.s32.totalorder %s275_s13, %s275_s13 }
  0x2f   :  { %p382_p2 = scmp.ne.s32.totalorder %s275_s13, %s381_s14  ;;  %p387_p4 = scmp.lt.s32.totalorder %s381_s14, %s381_s14 }
  0x31   :  { %318 = vmatpush1.bf16.msra.mxu1 %v317_v14  ;;  %p388_p5 = por %p387_p4, %p386_p3 }
  0x33   :  { %p389_p6 = pnand %p388_p5, %p382_p2 }
  0xfd   :  { %v133_v16 = vpop.f32.mrb[0].mxu0 }
  0xfe   :  { %v134_v17 = vadd.f32 %v301_v15, %v133_v16  ;;  %v310_v18 = vpop.f32.mrb[1].mxu0 }
 0x100   :  { %v137_v19 = vmax.f32 %v134_v17, 0.0 }
 0x102   :  { %303 = vmatmul.mubr.msk.f32.vlgmr.msra.gmra.mrb[0].mxu1 %vm158_vm2, %v137_v19 }
 0x1d5   :  { %v228_v27 = vpop.f32.mrb[0].mxu1 }
 0x1d6   :  { %v229_v28 = vadd.f32 %v228_v27, %v151_v25  ;;  %v230_v29 = vpop.f32.mrb[1].mxu1 }
 0x1d7   :  { %v231_v30 = vadd.f32 %v230_v29, %v155_v26 }
 0x1d8   :  { %233 = vmax.xlane.f32.xlu0 %v229_v28 }
 0x1d9   :  { %v247_v31 = vmul.f32 1.442695, %v231_v30 }
 0x1db   :  { %331 = vpow2.f32 %v247_v31 }
 0x1e5   :  { %v332_v32 = vpop.eup %331 }
 0x1e6   :  { %249 = vst.msk [vmem:[#allocation8] sm:$0xff] %vm245_vm3, %v332_v32 }
 0x265   :  { %v234_v35 = vpop.xlane.xlu0 %233 }
 0x266   :  { %v235_v36 = vsub.f32 %v229_v28, %v234_v35 }
 0x268   :  { %v236_v37 = vmul.f32 1.442695, %v235_v36 }
 0x26a   :  { %333 = vpow2.f32 %v236_v37 }
 0x274   :  { %v334_v38 = vpop.eup %333 }
 0x275   :  { %238 = vadd.xlane.f32.xlu0 %v334_v38 }
 0x276   :  { %392 = shalt.err (!%p389_p6)
}
 0x277   :  { %s393_s16 = scalar_lea.hbm %s599_s7, 128 }
 0x278   :  { %p394_p7 = scmp.ne.s32.totalorder %s599_s7, %s393_s16  ;;  %p397_p8 = scmp.lt.u32.totalorder %s393_s16, %s599_s7 }
 0x27a   :  { %p399_p9 = pnand %p397_p8, %p394_p7 }
 0x27c   :  { %402 = shalt.err (!%p399_p9)
}
 0x27d   :  { %277 = dma.vmem_to_hbm [thread:$0]  %s275_s13, 128, %s599_s7, [#allocation9]   ;;  %v254_v44 = vpop.permute.xlu1 %253 }
 0x27e   :  { %s463_s23 = smov [#allocation7]   ;;  %s464_s25 = smov [#allocation10]  }
 0x27f   :  { %s264_s24 = sshll.u32 %s463_s23, 4  ;;  %s284_s26 = sshll.u32 %s464_s25, 4  ;;  %s265_s24 = int_to_ptr.vmem [resolvable:$true] %s264_s24  ;;  %s285_s26 = int_to_ptr.vmem [resolvable:$true] %s284_s26 }
 0x280   :  { %s403_s1 = scalar_lea.vmem %s265_s24, 128  ;;  %p408_p11 = scmp.lt.s32.totalorder %s265_s24, %s265_s24 }
 0x281   :  { %p404_p10 = scmp.ne.s32.totalorder %s265_s24, %s403_s1  ;;  %p409_p12 = scmp.lt.s32.totalorder %s403_s1, %s403_s1 }
 0x283   :  { %p410_p13 = por %p409_p12, %p408_p11 }
 0x285   :  { %p411_p0 = pnand %p410_p13, %p404_p10 }
 0x302   :  { %v239_v39 = vpop.xlane.xlu0 %238 }
 0x303   :  { %335 = vrcp.f32 %v239_v39 }
 0x30d   :  { %v336_v40 = vpop.eup %335 }
 0x30e   :  { %v241_v41 = vmul.f32 %v336_v40, %v239_v39 }
 0x310   :  { %v242_v42 = vsub.f32 2.0, %v241_v41 }
 0x312   :  { %v243_v43 = vmul.f32 %v336_v40, %v242_v42 }
 0x314   :  { %v244_v45 = vmul.f32 %v334_v38, %v243_v43 }
 0x316   :  { %v256_v46 = vmul.f32 %v254_v44, %v244_v45  ;;  %246 = vst.msk [vmem:[#allocation7] sm:$0xff] %vm245_vm3, %v244_v45 }
 0x317   :  { %414 = shalt.err (!%p411_p0)
}
 0x318   :  { %s415_s28 = scalar_lea.hbm %s598_s6, 128 }
 0x319   :  { %p416_p1 = scmp.ne.s32.totalorder %s598_s6, %s415_s28  ;;  %p419_p2 = scmp.lt.u32.totalorder %s415_s28, %s598_s6 }
 0x31b   :  { %p421_p3 = pnand %p419_p2, %p416_p1 }
 0x31d   :  { %424 = shalt.err (!%p421_p3)
}
 0x31e   :  { %267 = dma.vmem_to_hbm [thread:$0]  %s265_s24, 128, %s598_s6, [#allocation4]   ;;  %257 = vst.msk [vmem:[#allocation10] sm:$0xff] %vm245_vm3, %v256_v46 }
 0x31f   :  { %s425_s11 = scalar_lea.vmem %s285_s26, 128  ;;  %p430_p5 = scmp.lt.s32.totalorder %s285_s26, %s285_s26 }
 0x320   :  { %p426_p4 = scmp.ne.s32.totalorder %s285_s26, %s425_s11  ;;  %p431_p6 = scmp.lt.s32.totalorder %s425_s11, %s425_s11 }
 0x322   :  { %p432_p7 = por %p431_p6, %p430_p5 }
 0x324   :  { %p433_p8 = pnand %p432_p7, %p426_p4 }
 0x326   :  { %436 = shalt.err (!%p433_p8)
}
 0x327   :  { %s437_s4 = scalar_lea.hbm %s600_s8, 128 }
 0x328   :  { %p438_p9 = scmp.ne.s32.totalorder %s600_s8, %s437_s4  ;;  %p441_p10 = scmp.lt.u32.totalorder %s437_s4, %s600_s8 }
 0x32a   :  { %p443_p11 = pnand %p441_p10, %p438_p9 }
 0x32c   :  { %446 = shalt.err (!%p443_p11)
}
 0x32d   :  { %287 = dma.vmem_to_hbm [thread:$0]  %s285_s26, 128, %s600_s8, [#allocation9]  }
 0x32e   :  { %451 = dma.done.wait [#allocation4], 128  }
 0x32f   :  { %452 = vsyncadd [#allocation4], 4294967168 }
 0x330   :  { %453 = dma.done.wait [#allocation9], 256  }
 0x331   :  { %454 = vsyncadd [#allocation9], 4294967040 }
 0x332   :  { %297 = vsyncpa [#allocation3], 1 }
 0x333   :  { %298 = vsyncpa [#allocation6], 1 }
 0x334   :  { %299 = vsyncpa [#allocation4], 1 }
 0x335   :  { %300 = vsyncpa [#allocation9], 1 }

</bundles_post_ra>
